<compile_context>
chip_gen: v7x
topology: tpu7x:2x2x1
jax: 0.10.0
libtpu: 0.0.40
codegen_flags: <defaults>
</compile_context>

<pallas_src>
import functools

import jax
import jax.numpy as jnp
from jax.experimental import pallas as pl
from jax.experimental.pallas import tpu as pltpu

HIDDEN = 64


def mlp_kernel(x_ref, w1_ref, b1_ref, w2_ref, b2_ref, w3_ref, b3_ref, o_ref,
               *, matmul_dtype):
    # x_ref : (1, tb)      batch on lanes
    # w1_ref: (64, 1)      fc1.weight (out, in=1)
    # b1_ref: (64, 1)
    # w2_ref: (64, 64)     fc2.weight (out, in)
    # b2_ref: (64, 1)
    # w3_ref: (64, 1)      fc3.weight transposed to a column
    # b3_ref: (1,)         SMEM scalar
    # o_ref : (1, tb)
    x = x_ref[...]                                              # (1, tb)

    # --- layer 1: K=1 contraction -> pure VPU broadcast multiply -------------
    h1 = jnp.maximum(w1_ref[...] * x + b1_ref[...], 0.0)        # (64, tb)

    # --- layer 2: the only real matmul -> MXU, f32 accumulation --------------
    h2 = jnp.dot(w2_ref[...].astype(matmul_dtype),
                 h1.astype(matmul_dtype),
                 preferred_element_type=jnp.float32)            # (64, tb)
    h2 = jnp.maximum(h2 + b2_ref[...], 0.0)

    # --- layer 3: out width 1 -> VPU multiply + sublane (XLU) reduce ---------
    out = jnp.sum(w3_ref[...] * h2, axis=0, keepdims=True) + b3_ref[0]  # (1, tb)
    o_ref[...] = out.astype(o_ref.dtype)


def function_approximator(x, params, *, tb=1024, matmul_dtype=jnp.float32):
    """x: (N, 1) float32. params: PyTorch-convention weights (out, in) + (out,) biases."""
    N = x.shape[0]
    assert tb % 128 == 0, "batch tile must be a multiple of 128 (lane-dense stores)"
    n_pad = -(-N // tb) * tb                      # pad batch up to a tile multiple
    grid = n_pad // tb

    # Wrapper-side layout plumbing (cheap, outside the kernel).
    x_t = jnp.zeros((1, n_pad), jnp.float32).at[:, :N].set(x.reshape(1, N))

    w1 = params["w1"].astype(jnp.float32)                       # (64, 1)
    b1 = params["b1"].reshape(HIDDEN, 1).astype(jnp.float32)    # (64, 1)
    w2 = params["w2"].astype(jnp.float32)                       # (64, 64) (out, in)
    b2 = params["b2"].reshape(HIDDEN, 1).astype(jnp.float32)    # (64, 1)
    w3 = params["w3"].reshape(HIDDEN, 1).astype(jnp.float32)    # (1, 64) -> (64, 1)
    b3 = params["b3"].reshape(1).astype(jnp.float32)            # (1,) scalar -> SMEM

    # Weights use a constant block index so they stay resident in VMEM.
    full = lambda shape: pl.BlockSpec(shape, lambda i: (0, 0))

    weight_bytes = 4 * (w1.size + b1.size + w2.size + b2.size + w3.size + b3.size)
    cost = pl.CostEstimate(
        flops=2 * n_pad * (HIDDEN + HIDDEN * HIDDEN + HIDDEN),
        transcendentals=0,
        bytes_accessed=8 * n_pad + weight_bytes,
    )

    kernel = functools.partial(mlp_kernel, matmul_dtype=matmul_dtype)

    out_t = pl.pallas_call(
        kernel,
        out_shape=jax.ShapeDtypeStruct((1, n_pad), jnp.float32),
        grid_spec=pltpu.PrefetchScalarGridSpec(
            num_scalar_prefetch=0,
            grid=(grid,),
            in_specs=[
                pl.BlockSpec((1, tb), lambda i: (0, i)),            # x: batch on lanes
                full(w1.shape), full(b1.shape),
                full(w2.shape), full(b2.shape),
                full(w3.shape),
                pl.BlockSpec(memory_space=pltpu.MemorySpace.SMEM),  # b3 scalar
            ],
            out_specs=pl.BlockSpec((1, tb), lambda i: (0, i)),
        ),
        compiler_params=pltpu.CompilerParams(
            dimension_semantics=("parallel",),
        ),
        cost_estimate=cost,
    )(x_t, w1, b1, w2, b2, w3, b3)

    return out_t[:, :N].reshape(N, 1)


def init_params(key):
    """PyTorch nn.Linear-style init: weight (out, in), bias (out,), uniform +/-1/sqrt(fan_in)."""
    ks = jax.random.split(key, 6)

    def linear(kw, kb, fan_in, fan_out):
        bound = 1.0 / jnp.sqrt(jnp.float32(fan_in))
        w = jax.random.uniform(kw, (fan_out, fan_in), jnp.float32, -bound, bound)
        b = jax.random.uniform(kb, (fan_out,), jnp.float32, -bound, bound)
        return w, b

    w1, b1 = linear(ks[0], ks[1], 1, HIDDEN)
    w2, b2 = linear(ks[2], ks[3], HIDDEN, HIDDEN)
    w3, b3 = linear(ks[4], ks[5], HIDDEN, 1)
    return {"w1": w1, "b1": b1, "w2": w2, "b2": b2, "w3": w3, "b3": b3}


def reference(x, p):
    """Pure-JAX reference matching torch semantics: y = x @ W.T + b."""
    h1 = jnp.maximum(x @ p["w1"].T + p["b1"], 0.0)
    h2 = jnp.maximum(h1 @ p["w2"].T + p["b2"], 0.0)
    return h2 @ p["w3"].T + p["b3"]


if __name__ == "__main__":
    key = jax.random.PRNGKey(0)
    k_param, k_x = jax.random.split(key)

    params = init_params(k_param)
    N = 512
    x = jax.random.uniform(k_x, (N, 1), jnp.float32, -3.0, 3.0)

    ref = reference(x, params)

    # Exact path (f32 matmul) — tight tolerance vs reference.
    out_f32 = function_approximator(x, params, tb=256, matmul_dtype=jnp.float32)
    out_f32 = jax.block_until_ready(out_f32)
    assert out_f32.shape == (N, 1)
    assert jnp.allclose(out_f32, ref, atol=1e-5, rtol=1e-5), "f32 mismatch vs reference"

    # Fast path (bf16 operands on the MXU, f32 accumulation) — looser tolerance.
    out_bf16 = function_approximator(x, params, tb=256, matmul_dtype=jnp.bfloat16)
    out_bf16 = jax.block_until_ready(out_bf16)
    assert jnp.allclose(out_bf16, ref, atol=1e-1, rtol=1e-1), "bf16 mismatch vs reference"

    # Ragged batch exercises the padding path.
    x_odd = x[:300]
    out_odd = function_approximator(x_odd, params, tb=256, matmul_dtype=jnp.float32)
    out_odd = jax.block_until_ready(out_odd)
    assert out_odd.shape == (300, 1)
    assert jnp.allclose(out_odd, ref[:300], atol=1e-5, rtol=1e-5), "padded-batch mismatch"

    print("KERNEL_OK")
</pallas_src>

<mosaic_0001>
module attributes {stable_mosaic.version = 11 : i64} {
  func.func @mlp_kernel(%arg0: i32, %arg1: memref<1x256xf32, #tpu.memory_space<vmem>>, %arg2: memref<64x1xf32, #tpu.memory_space<vmem>>, %arg3: memref<64x1xf32, #tpu.memory_space<vmem>>, %arg4: memref<64x64xf32, #tpu.memory_space<vmem>>, %arg5: memref<64x1xf32, #tpu.memory_space<vmem>>, %arg6: memref<64x1xf32, #tpu.memory_space<vmem>>, %arg7: memref<1xf32, #tpu.memory_space<smem>>, %arg8: memref<1x256xf32, #tpu.memory_space<vmem>>) attributes {dimension_semantics = [#tpu.dimension_semantics<parallel>], iteration_bounds = array<i64: 2>, scalar_prefetch = 0 : i64, scratch_operands = 0 : i64, tpu.core_type = #tpu.core_type<tc>, window_params = [{transform_indices = @transform_0, window_bounds = array<i64: 1, 256>}, {pipeline_mode = #tpu.pipeline_mode<synchronous>, transform_indices = @transform_1, window_bounds = array<i64: 64, 1>}, {pipeline_mode = #tpu.pipeline_mode<synchronous>, transform_indices = @transform_2, window_bounds = array<i64: 64, 1>}, {pipeline_mode = #tpu.pipeline_mode<synchronous>, transform_indices = @transform_3, window_bounds = array<i64: 64, 64>}, {pipeline_mode = #tpu.pipeline_mode<synchronous>, transform_indices = @transform_4, window_bounds = array<i64: 64, 1>}, {pipeline_mode = #tpu.pipeline_mode<synchronous>, transform_indices = @transform_5, window_bounds = array<i64: 64, 1>}, {transform_indices = @transform_6, window_bounds = array<i64: 1>}, {transform_indices = @transform_7, window_bounds = array<i64: 1, 256>}]} {
    %c0 = arith.constant 0 : index
    %c0_0 = arith.constant 0 : index
    %0 = vector.load %arg1[%c0, %c0_0] : memref<1x256xf32, #tpu.memory_space<vmem>>, vector<1x256xf32>
    %c0_1 = arith.constant 0 : index
    %c0_2 = arith.constant 0 : index
    %1 = vector.load %arg2[%c0_1, %c0_2] : memref<64x1xf32, #tpu.memory_space<vmem>>, vector<64x1xf32>
    %2 = vector.broadcast %1 : vector<64x1xf32> to vector<64x256xf32>
    %3 = vector.broadcast %0 : vector<1x256xf32> to vector<64x256xf32>
    %4 = arith.mulf %2, %3 : vector<64x256xf32>
    %c0_3 = arith.constant 0 : index
    %c0_4 = arith.constant 0 : index
    %5 = vector.load %arg3[%c0_3, %c0_4] : memref<64x1xf32, #tpu.memory_space<vmem>>, vector<64x1xf32>
    %6 = vector.broadcast %5 : vector<64x1xf32> to vector<64x256xf32>
    %7 = arith.addf %4, %6 : vector<64x256xf32>
    %cst = arith.constant 0.000000e+00 : f32
    %8 = vector.broadcast %cst : f32 to vector<64x256xf32>
    %9 = arith.maximumf %7, %8 : vector<64x256xf32>
    %c0_5 = arith.constant 0 : index
    %c0_6 = arith.constant 0 : index
    %10 = vector.load %arg4[%c0_5, %c0_6] : memref<64x64xf32, #tpu.memory_space<vmem>>, vector<64x64xf32>
    %cst_7 = arith.constant dense<0.000000e+00> : vector<64x256xf32>
    %11 = tpu.matmul %10, %9, %cst_7 {dimension_numbers = #tpu.dot_dimension_numbers<[1], [0], [0], [1], [0, 0, 1, 1], [], []>} : vector<64x64xf32>, vector<64x256xf32>, vector<64x256xf32> -> vector<64x256xf32>
    %c0_8 = arith.constant 0 : index
    %c0_9 = arith.constant 0 : index
    %12 = vector.load %arg5[%c0_8, %c0_9] : memref<64x1xf32, #tpu.memory_space<vmem>>, vector<64x1xf32>
    %13 = vector.broadcast %12 : vector<64x1xf32> to vector<64x256xf32>
    %14 = arith.addf %11, %13 : vector<64x256xf32>
    %cst_10 = arith.constant 0.000000e+00 : f32
    %15 = vector.broadcast %cst_10 : f32 to vector<64x256xf32>
    %16 = arith.maximumf %14, %15 : vector<64x256xf32>
    %c0_11 = arith.constant 0 : index
    %c0_12 = arith.constant 0 : index
    %17 = vector.load %arg6[%c0_11, %c0_12] : memref<64x1xf32, #tpu.memory_space<vmem>>, vector<64x1xf32>
    %18 = vector.broadcast %17 : vector<64x1xf32> to vector<64x256xf32>
    %19 = arith.mulf %18, %16 : vector<64x256xf32>
    %cst_13 = arith.constant dense<0.000000e+00> : vector<256xf32>
    %20 = vector.multi_reduction <add>, %19, %cst_13 [0] : vector<64x256xf32> to vector<256xf32>
    %21 = vector.shape_cast %20 : vector<256xf32> to vector<1x256xf32>
    %c0_14 = arith.constant 0 : index
    %22 = memref.load %arg7[%c0_14] : memref<1xf32, #tpu.memory_space<smem>>
    %23 = vector.broadcast %22 : f32 to vector<1x256xf32>
    %24 = arith.addf %21, %23 : vector<1x256xf32>
    %c0_15 = arith.constant 0 : index
    %c0_16 = arith.constant 0 : index
    %25 = vector.load %arg8[%c0_15, %c0_16] : memref<1x256xf32, #tpu.memory_space<vmem>>, vector<1x256xf32>
    tpu.vector_store %arg8[%c0_15, %c0_16], %24 {strides = array<i32>} : memref<1x256xf32, #tpu.memory_space<vmem>>, vector<1x256xf32>,
    return
  }
  func.func @transform_0(%arg0: i32) -> (i32, i32) {
    %c0_i32 = arith.constant 0 : i32
    %c0_i32_0 = arith.constant 0 : i32
    return %c0_i32, %arg0 : i32, i32
  }
  func.func @transform_1(%arg0: i32) -> (i32, i32) {
    %c0_i32 = arith.constant 0 : i32
    %c0_i32_0 = arith.constant 0 : i32
    %c0_i32_1 = arith.constant 0 : i32
    return %c0_i32, %c0_i32_0 : i32, i32
  }
  func.func @transform_2(%arg0: i32) -> (i32, i32) {
    %c0_i32 = arith.constant 0 : i32
    %c0_i32_0 = arith.constant 0 : i32
    %c0_i32_1 = arith.constant 0 : i32
    return %c0_i32, %c0_i32_0 : i32, i32
  }
  func.func @transform_3(%arg0: i32) -> (i32, i32) {
    %c0_i32 = arith.constant 0 : i32
    %c0_i32_0 = arith.constant 0 : i32
    %c0_i32_1 = arith.constant 0 : i32
    return %c0_i32, %c0_i32_0 : i32, i32
  }
  func.func @transform_4(%arg0: i32) -> (i32, i32) {
    %c0_i32 = arith.constant 0 : i32
    %c0_i32_0 = arith.constant 0 : i32
    %c0_i32_1 = arith.constant 0 : i32
    return %c0_i32, %c0_i32_0 : i32, i32
  }
  func.func @transform_5(%arg0: i32) -> (i32, i32) {
    %c0_i32 = arith.constant 0 : i32
    %c0_i32_0 = arith.constant 0 : i32
    %c0_i32_1 = arith.constant 0 : i32
    return %c0_i32, %c0_i32_0 : i32, i32
  }
  func.func @transform_6(%arg0: i32) -> i32 {
    %c0_i32 = arith.constant 0 : i32
    %c0_i32_0 = arith.constant 0 : i32
    return %c0_i32 : i32
  }
  func.func @transform_7(%arg0: i32) -> (i32, i32) {
    %c0_i32 = arith.constant 0 : i32
    %c0_i32_0 = arith.constant 0 : i32
    return %c0_i32, %arg0 : i32, i32
  }
}

</mosaic_0001>

<bundles_post_ra>
// kernel: tpu_custom_call.1
= control target key start
LH: loop header
LB: loop body
LE: loop exit
PB: predicated region body
PF: predicated region fallthrough
CT: control target
= control target key end

     0   :  { %s1293_s0 = inlined_call_operand.vmem [shape: f32[1,512], index: 0, kind: input, shape index: {}]   ;;  %s1294_s1 = inlined_call_operand.vmem [shape: f32[64,1], index: 1, kind: input, shape index: {}]   ;;  %s1295_s2 = inlined_call_operand.vmem [shape: f32[64,1], index: 2, kind: input, shape index: {}]   ;;  %s1296_s3 = inlined_call_operand.vmem [shape: f32[64,64], index: 3, kind: input, shape index: {}]   ;;  %s1297_s4 = inlined_call_operand.vmem [shape: f32[64,1], index: 4, kind: input, shape index: {}]   ;;  %s1298_s5 = inlined_call_operand.vmem [shape: f32[64,1], index: 5, kind: input, shape index: {}]   ;;  %s1299_s6 = inlined_call_operand.<no memory space> [shape: f32[1], index: 6, kind: input, shape index: {}]   ;;  %s1300_s7 = inlined_call_operand.hbm [shape: f32[1,512], index: 7, kind: output, shape index: {}]  }
   0x1   :  { %12 = sst [smem:[#allocation2]] %s1299_s6 }
   0x2   :  { %13 = vsyncpa [#allocation4], 0 }
   0x3   :  { %15 = vsyncpa [#allocation4 + $0x1], 0  ;;  %s1031_s26 = smov 0   ;;  %s1033_s27 = smov 0  }
   0x4   :  { %s1035_s28 = smov 0   ;;  %s1037_s29 = smov 0  }
   0x5 LB: > { %s1052_s6 = sadd.s32 4294967295, %s982_s29   ;;  %s832_s30 = sadd.s32 4294967294, %s982_s29   ;;  %s982_s29 = sphi %s1037_s29, %s1306_s29   ;;  %s978_s28 = sphi %s1035_s28, %s1305_s28   ;;  %s974_s27 = sphi %s1033_s27, %s1304_s27   ;;  %s970_s26 = sphi %s1031_s26, %s1303_s26  }
   0x6   : > { %s1056_s8 = sadd.s32 1, %s982_s29   ;;  %s180_s9 = sadd.s32 1, %s978_s28 }
   0x7   : > { %s177_s10 = ssub.s32 %s982_s29, %s1056_s8  ;;  %p190_p0 = scmp.ne.s32.totalorder %s978_s28, %s974_s27 }
   0x8   : > { %p178_p1 = scmp.eq.s32.totalorder %s177_s10, 0  ;;  %p191_p2 = scmp.eq.s32.totalorder %s1052_s6, 1 }
   0x9   : > { %p196_p3 = scmp.ne.s32.totalorder %s974_s27, %s970_s26  ;;  %p197_p4 = scmp.eq.s32.totalorder %s832_s30, 1 }
   0xa   : > { %s1067_s11 = scalar_select %p178_p1, %s978_s28, %s180_s9  }
   0xb   : > { %p1069_p5 = por %p191_p2, %p190_p0  ;;  %p1073_p6 = por %p197_p4, %p196_p3 }
   0xc   : > { %p835_p7 = scmp.ge.s32.totalorder %s982_s29, 1  ;;  %p241_p8 = scmp.lt.s32.totalorder %s982_s29, 3 }
   0xe   : > { %p242_p9 = pnand %p835_p7, %p241_p8 }
   0xf   : > { %v354_v0 = vld [vmem:[%s1295_s2] sm:$0xff] (!%p242_p9)  ;;  %v984_v2 = vmov (!%p242_p9), 0   ;;  %v355_v3 = vld [vmem:[%s1295_s2 + $0x8] sm:$0xff] (!%p242_p9)  ;;  %v282_v5 = vld [vmem:[%s1294_s1 + $0x18] sm:$0xff] (!%p242_p9)  ;;  %v985_v23 = vmov (!%p242_p9), 0.0   ;;  %s837_s18 = sshll.u32 (!%p242_p9), %s1052_s6, 1  ;;  %v328_v34 = vlaneseq (!%p242_p9) }
  0x10   : > { %245 = sbr.rel (%p242_p9) target bundleno = 458 (0x1ca), region = 48  ;;  %v279_v1 = vld [vmem:[%s1294_s1] sm:$0xff] (!%p242_p9)  ;;  %919 = vset.pattern.permute.xlu1 (!%p242_p9), %v984_v2  ;;  %918 = vset.pattern.permute.xlu0 (!%p242_p9), %v984_v2  ;;  %v280_v4 = vld [vmem:[%s1294_s1 + $0x8] sm:$0xff] (!%p242_p9)  ;;  %v281_v6 = vld [vmem:[%s1294_s1 + $0x10] sm:$0xff] (!%p242_p9)  ;;  %p273_p10 = scmp.lt.s32.totalorder (!%p242_p9), %s837_s18, 3  ;;  %vm490_vm0 = vcmask (!%p242_p9), 523264  }
  0x11   : > { %364 = vperm.xlu1 (!%p242_p9), %919, %v354_v0   ;;  %289 = vperm.xlu0 (!%p242_p9), %918, %v279_v1   ;;  %v357_v7 = vld [vmem:[%s1295_s2 + $0x18] sm:$0xff] (!%p242_p9)  ;;  %v356_v8 = vld [vmem:[%s1295_s2 + $0x10] sm:$0xff] (!%p242_p9)  ;;  %v284_v9 = vld [vmem:[%s1294_s1 + $0x28] sm:$0xff] (!%p242_p9)  ;;  %v1179_v35 = vshrl.u32 (!%p242_p9), %v328_v34, 7  ;;  %s734_s23 = sld [smem:[#allocation2]] (!%p242_p9)  ;;  %s269_s24 = sand.u32 (!%p242_p9), 1, %s974_s27  }
  0x12   : > { %v283_v10 = vld [vmem:[%s1294_s1 + $0x20] sm:$0xff] (!%p242_p9)  ;;  %v359_v11 = vld [vmem:[%s1295_s2 + $0x28] sm:$0xff] (!%p242_p9)  ;;  %v286_v13 = vld [vmem:[%s1294_s1 + $0x38] sm:$0xff] (!%p242_p9)  ;;  %579 = vmatprep.mubr.f32.mxu0 (!%p242_p9), %v985_v23  ;;  %603 = vmatprep.mubr.f32.mxu1 (!%p242_p9), %v985_v23  ;;  %s836_s25 = sshll.u32 (!%p242_p9), %s269_s24, 1  ;;  %s851_s30 = sshll.u32 (!%p242_p9), %s1052_s6, 5  ;;  %vm758_vm1 = vcmp.lt.s32.totalorder (!%p242_p9), %v328_v34, 256 }
  0x13   : > { %v358_v12 = vld [vmem:[%s1295_s2 + $0x20] sm:$0xff] (!%p242_p9)  ;;  %v285_v14 = vld [vmem:[%s1294_s1 + $0x30] sm:$0xff] (!%p242_p9)  ;;  %v361_v15 = vld [vmem:[%s1295_s2 + $0x38] sm:$0xff] (!%p242_p9)  ;;  %v330_v36 = vsub.s32 (!%p242_p9), 0, %v1179_v35  ;;  %v334_v37 = vsub.s32 (!%p242_p9), 1, %v1179_v35  ;;  %s271_s9 = scalar_lea.vmem (!%p242_p9), [#allocation3], %s836_s25  ;;  %s1251_s16 = scalar_lea.hbm (!%p242_p9), %s1300_s7, %s851_s30 }
  0x14   : > { %v360_v16 = vld [vmem:[%s1295_s2 + $0x30] sm:$0xff] (!%p242_p9)  ;;  %v443_v17 = vld [vmem:[%s1297_s4 + $0x8] sm:$0xff] (!%p242_p9)  ;;  %v442_v18 = vld [vmem:[%s1297_s4] sm:$0xff] (!%p242_p9)  ;;  %s776_s10 = sshll.u32 (!%p242_p9), %s271_s9, 4  ;;  %s762_s17 = scalar_lea.sflag (!%p242_p9), [#allocation4], %s269_s24  ;;  %s1253_s10 = int_to_ptr.vmem [resolvable:$true] %s776_s10 }
  0x15   : > { %369 = vperm.xlu1 (!%p242_p9), %919, %v355_v3   ;;  %294 = vperm.xlu0 (!%p242_p9), %918, %v280_v4   ;;  %v445_v19 = vld [vmem:[%s1297_s4 + $0x18] sm:$0xff] (!%p242_p9)  ;;  %v444_v20 = vld [vmem:[%s1297_s4 + $0x10] sm:$0xff] (!%p242_p9)  ;;  %v645_v21 = vld [vmem:[%s1298_s5 + $0x8] sm:$0xff] (!%p242_p9)  ;;  %s987_s6 = smov (!%p242_p9), [#allocation3]  }
  0x16   : > { %v644_v22 = vld [vmem:[%s1298_s5] sm:$0xff] (!%p242_p9)  ;;  %v646_v24 = vld [vmem:[%s1298_s5 + $0x10] sm:$0xff] (!%p242_p9)  ;;  %v647_v26 = vld [vmem:[%s1298_s5 + $0x18] sm:$0xff] (!%p242_p9)  ;;  %s924_s19 = sshll.u32 (!%p242_p9), %s987_s6, 4  ;;  %s925_s19 = int_to_ptr.vmem [resolvable:$false] %s924_s19 }
  0x17   : > { %v446_v25 = vld [vmem:[%s1297_s4 + $0x20] sm:$0xff]  ;;  %v447_v27 = vld [vmem:[%s1297_s4 + $0x28] sm:$0xff]  ;;  %v448_v29 = vld [vmem:[%s1297_s4 + $0x30] sm:$0xff]  ;;  %s1308_s18 = smov (!%p273_p10, %s837_s18), 3  ;;  %s926_s20 = scalar_lea.vmem %s925_s19, 64 }
  0x18   : > { %v648_v28 = vld [vmem:[%s1298_s5 + $0x20] sm:$0xff]  ;;  %v649_v30 = vld [vmem:[%s1298_s5 + $0x28] sm:$0xff]  ;;  %v449_v31 = vld [vmem:[%s1297_s4 + $0x38] sm:$0xff]  ;;  %s275_s21 = scalar_lea.vmem %s1293_s0, %s1308_s18  ;;  %s920_s18 = scalar_lea.vmem %s1253_s10, 32 }
  0x19   : > { %304 = vperm.xlu1 %919, %v282_v5   ;;  %299 = vperm.xlu0 %918, %v281_v6   ;;  %v651_v32 = vld [vmem:[%s1298_s5 + $0x38] sm:$0xff]  ;;  %v650_v33 = vld [vmem:[%s1298_s5 + $0x30] sm:$0xff]  ;;  %v278_v38 = vld [vmem:[%s275_s21] sm:$0x3]  ;;  %p921_p11 = scmp.ne.s32.totalorder %s1253_s10, %s920_s18  ;;  %p927_p0 = scmp.lt.s32.totalorder %s1253_s10, %s925_s19 }
  0x1a   : > { %v1186_v39 = vrot.slane %v278_v38, %v330_v36  ;;  %v1188_v40 = vrot.slane %v278_v38, %v334_v37  ;;  %p928_p1 = scmp.lt.s32.totalorder %s926_s20, %s920_s18 }
  0x1b   : > { %p922_p12 = pnand %p921_p11, %p1069_p5 }
  0x1c   : > { %p929_p2 = por %p928_p1, %p927_p0 }
  0x1d   : > { %379 = vperm.xlu1 %919, %v357_v7   ;;  %374 = vperm.xlu0 %918, %v356_v8   ;;  %p923_p13 = pneg %p922_p12 }
  0x1f   : > { %p930_p3 = pnand %p929_p2, %p923_p13 }
  0x21   : > { %314 = vperm.xlu1 %919, %v284_v9   ;;  %309 = vperm.xlu0 %918, %v283_v10  }
  0x25   : > { %389 = vperm.xlu1 %919, %v359_v11   ;;  %384 = vperm.xlu0 %918, %v358_v12  }
  0x29   : > { %324 = vperm.xlu1 %919, %v286_v13   ;;  %319 = vperm.xlu0 %918, %v285_v14  }
  0x2d   : > { %399 = vperm.xlu1 %919, %v361_v15   ;;  %394 = vperm.xlu0 %918, %v360_v16  }
  0x31   : > { %457 = vperm.xlu1 %919, %v443_v17   ;;  %452 = vperm.xlu0 %918, %v442_v18  }
  0x35   : > { %467 = vperm.xlu1 %919, %v445_v19   ;;  %462 = vperm.xlu0 %918, %v444_v20  }
  0x39   : > { %659 = vperm.xlu1 %919, %v645_v21   ;;  %654 = vperm.xlu0 %918, %v644_v22  }
  0x3d   : > { %664 = vperm.xlu1 %919, %v646_v24   ;;  %472 = vperm.xlu0 %918, %v446_v25  }
  0x41   : > { %669 = vperm.xlu1 %919, %v647_v26   ;;  %477 = vperm.xlu0 %918, %v447_v27  }
  0x45   : > { %674 = vperm.xlu1 %919, %v648_v28   ;;  %482 = vperm.xlu0 %918, %v448_v29  }
  0x49   : > { %679 = vperm.xlu1 %919, %v649_v30   ;;  %487 = vperm.xlu0 %918, %v449_v31  }
  0x4d   : > { %689 = vperm.xlu1 %919, %v651_v32   ;;  %684 = vperm.xlu0 %918, %v650_v33  }
  0x90   : > { %v365_v41 = vpop.permute.xlu1 %364  ;;  %v290_v42 = vpop.permute.xlu0 %289 }
  0x91   : > { %v338_v43 = vmul.f32 %v1186_v39, %v290_v42  ;;  %v339_v44 = vmul.f32 %v1188_v40, %v290_v42 }
  0x93   : > { %v402_v49 = vadd.f32 %v365_v41, %v338_v43  ;;  %v403_v50 = vadd.f32 %v365_v41, %v339_v44 }
  0x94   : > { %v370_v45 = vpop.permute.xlu1 %369  ;;  %v295_v46 = vpop.permute.xlu0 %294 }
  0x95   : > { %v340_v47 = vmul.f32 %v1186_v39, %v295_v46  ;;  %v341_v48 = vmul.f32 %v1188_v40, %v295_v46  ;;  %v419_v55 = vmax.f32 %v403_v50, 0.0  ;;  %v418_v57 = vmax.f32 %v402_v49, 0.0 }
  0x97   : > { %v404_v51 = vadd.f32 %v370_v45, %v340_v47  ;;  %v405_v52 = vadd.f32 %v370_v45, %v341_v48 }
  0x98   : > { %v305_v53 = vpop.permute.xlu1 %304  ;;  %v300_v54 = vpop.permute.xlu0 %299 }
  0x99   : > { %v421_v56 = vmax.f32 %v405_v52, 0.0  ;;  %v420_v58 = vmax.f32 %v404_v51, 0.0  ;;  %v344_v59 = vmul.f32 %v1186_v39, %v305_v53  ;;  %v345_v60 = vmul.f32 %v1188_v40, %v305_v53 }
  0x9a   : > { %v342_v61 = vmul.f32 %v1186_v39, %v300_v54  ;;  %v343_v62 = vmul.f32 %v1188_v40, %v300_v54  ;;  %v435_v54 = vld [vmem:[%s1296_s3 + $0x8] sm:$0xff] }
  0x9b   : > { %v852_v1 = vpack.c.bf16 %v421_v56, %v419_v55  ;;  %v854_v2 = vpack.c.bf16 %v420_v58, %v418_v57  ;;  %v439_v55 = vld [vmem:[%s1296_s3 + $0x28] sm:$0xff]  ;;  %v436_v56 = vld [vmem:[%s1296_s3 + $0x10] sm:$0xff]  ;;  %v437_v58 = vld [vmem:[%s1296_s3 + $0x18] sm:$0xff] }
  0x9c   : > { %v380_v63 = vpop.permute.xlu1 %379  ;;  %v375_v0 = vpop.permute.xlu0 %374  ;;  %v440_v57 = vld [vmem:[%s1296_s3 + $0x30] sm:$0xff] }
  0x9d   : > { %v408_v3 = vadd.f32 %v380_v63, %v344_v59  ;;  %v409_v4 = vadd.f32 %v380_v63, %v345_v60  ;;  %v406_v5 = vadd.f32 %v375_v0, %v342_v61  ;;  %v407_v6 = vadd.f32 %v375_v0, %v343_v62  ;;  %853 = vmatprep.subr.bf16.mxu0 %v852_v1  ;;  %v441_v59 = vld [vmem:[%s1296_s3 + $0x38] sm:$0xff] }
  0x9e   : > { %868 = vmatprep.subr.bf16.mxu1 %v852_v1  ;;  %855 = vmatpush1.bf16.msra.mxu0 %v854_v2 }
  0x9f   : > { %v424_v7 = vmax.f32 %v408_v3, 0.0  ;;  %v425_v8 = vmax.f32 %v409_v4, 0.0  ;;  %v422_v9 = vmax.f32 %v406_v5, 0.0  ;;  %v423_v10 = vmax.f32 %v407_v6, 0.0  ;;  %872 = vmatpush1.bf16.msra.mxu1 %v854_v2 }
  0xa0   : > { %v315_v11 = vpop.permute.xlu1 %314  ;;  %v310_v12 = vpop.permute.xlu0 %309 }
  0xa1   : > { %v856_v13 = vpack.c.bf16 %v425_v8, %v423_v10  ;;  %v858_v14 = vpack.c.bf16 %v424_v7, %v422_v9  ;;  %v348_v15 = vmul.f32 %v1186_v39, %v315_v11  ;;  %v349_v16 = vmul.f32 %v1188_v40, %v315_v11 }
  0xa2   : > { %v346_v17 = vmul.f32 %v1186_v39, %v310_v12  ;;  %v347_v18 = vmul.f32 %v1188_v40, %v310_v12 }
  0xa3   : > { %857 = vmatprep.subr.bf16.mxu0 %v856_v13  ;;  %869 = vmatprep.subr.bf16.mxu1 %v856_v13 }
  0xa4   : > { %v390_v19 = vpop.permute.xlu1 %389  ;;  %v385_v20 = vpop.permute.xlu0 %384  ;;  %859 = vmatpush1.bf16.msra.mxu0 %v858_v14  ;;  %873 = vmatpush1.bf16.msra.mxu1 %v858_v14 }
  0xa5   : > { %v412_v21 = vadd.f32 %v390_v19, %v348_v15  ;;  %v413_v22 = vadd.f32 %v390_v19, %v349_v16  ;;  %v410_v24 = vadd.f32 %v385_v20, %v346_v17  ;;  %v411_v25 = vadd.f32 %v385_v20, %v347_v18 }
  0xa7   : > { %v428_v26 = vmax.f32 %v412_v21, 0.0  ;;  %v429_v27 = vmax.f32 %v413_v22, 0.0  ;;  %v426_v28 = vmax.f32 %v410_v24, 0.0  ;;  %v427_v29 = vmax.f32 %v411_v25, 0.0 }
  0xa8   : > { %v325_v30 = vpop.permute.xlu1 %324  ;;  %v320_v31 = vpop.permute.xlu0 %319 }
  0xa9   : > { %v860_v32 = vpack.c.bf16 %v429_v27, %v427_v29  ;;  %v862_v33 = vpack.c.bf16 %v428_v26, %v426_v28  ;;  %v352_v36 = vmul.f32 %v1186_v39, %v325_v30  ;;  %v353_v37 = vmul.f32 %v1188_v40, %v325_v30 }
  0xaa   : > { %v350_v38 = vmul.f32 %v1186_v39, %v320_v31  ;;  %v351_v41 = vmul.f32 %v1188_v40, %v320_v31  ;;  %v434_v39 = vld [vmem:[%s1296_s3] sm:$0xff] }
  0xab   : > { %861 = vmatprep.subr.bf16.mxu0 %v860_v32  ;;  %870 = vmatprep.subr.bf16.mxu1 %v860_v32  ;;  %v438_v40 = vld [vmem:[%s1296_s3 + $0x20] sm:$0xff] }
  0xac   : > { %v400_v42 = vpop.permute.xlu1 %399  ;;  %v395_v43 = vpop.permute.xlu0 %394  ;;  %863 = vmatpush1.bf16.msra.mxu0 %v862_v33  ;;  %874 = vmatpush1.bf16.msra.mxu1 %v862_v33 }
  0xad   : > { %v416_v44 = vadd.f32 %v400_v42, %v352_v36  ;;  %v417_v45 = vadd.f32 %v400_v42, %v353_v37  ;;  %v414_v46 = vadd.f32 %v395_v43, %v350_v38  ;;  %v415_v47 = vadd.f32 %v395_v43, %v351_v41 }
  0xaf   : > { %v432_v48 = vmax.f32 %v416_v44, 0.0  ;;  %v433_v49 = vmax.f32 %v417_v45, 0.0  ;;  %v430_v50 = vmax.f32 %v414_v46, 0.0  ;;  %v431_v51 = vmax.f32 %v415_v47, 0.0 }
  0xb0   : > { %v458_v60 = vpop.permute.xlu1 %457  ;;  %v453_v61 = vpop.permute.xlu0 %452 }
  0xb1   : > { %v864_v52 = vpack.c.bf16 %v433_v49, %v431_v51  ;;  %v866_v53 = vpack.c.bf16 %v432_v48, %v430_v50 }
  0xb3   : > { %865 = vmatprep.subr.bf16.mxu0 %v864_v52  ;;  %871 = vmatprep.subr.bf16.mxu1 %v864_v52 }
  0xb4   : > { %867 = vmatpush1.bf16.msra.mxu0 %v866_v53  ;;  %875 = vmatpush1.bf16.msra.mxu1 %v866_v53  ;;  %v468_v62 = vpop.permute.xlu1 %467  ;;  %v463_v63 = vpop.permute.xlu0 %462 }
  0xb7   : > { %838 = vmatmul.mubr.msk.f32.vlgmr.msra.gmra.mrb[0].mxu0 %vm490_vm0, %v434_v39  ;;  %842 = vmatmul.mubr.msk.f32.vlgmr.msra.gmra.mrb[0].mxu1 %vm490_vm0, %v438_v40 }
  0xb8   : > { %585 = vmatprep.mubr.f32.mxu0 %v985_v23  ;;  %609 = vmatprep.mubr.f32.mxu1 %v985_v23  ;;  %v660_v0 = vpop.permute.xlu1 %659  ;;  %v655_v1 = vpop.permute.xlu0 %654 }
  0xbb   : > { %839 = vmatmul.mubr.msk.f32.gmra.mrb[2].mxu0 %vm490_vm0, %v435_v54  ;;  %843 = vmatmul.mubr.msk.f32.gmra.mrb[2].mxu1 %vm490_vm0, %v439_v55 }
  0xbc   : > { %591 = vmatprep.mubr.f32.mxu0 %v985_v23  ;;  %615 = vmatprep.mubr.f32.mxu1 %v985_v23  ;;  %v665_v2 = vpop.permute.xlu1 %664 }
  0xbf   : > { %840 = vmatmul.mubr.msk.f32.gmra.mrb[4].mxu0 %vm490_vm0, %v436_v56  ;;  %844 = vmatmul.mubr.msk.f32.gmra.mrb[4].mxu1 %vm490_vm0, %v440_v57 }
  0xc0   : > { %597 = vmatprep.mubr.f32.mxu0 %v985_v23  ;;  %621 = vmatprep.mubr.f32.mxu1 %v985_v23  ;;  %v473_v23 = vpop.permute.xlu0 %472  ;;  %v670_v9 = vpop.permute.xlu1 %669 }
  0xc3   : > { %841 = vmatmul.mubr.msk.f32.gmra.mrb[6].mxu0 %vm490_vm0, %v437_v58  ;;  %845 = vmatmul.mubr.msk.f32.gmra.mrb[6].mxu1 %vm490_vm0, %v441_v59 }
  0xc4   : > { %v478_v10 = vpop.permute.xlu0 %477  ;;  %v675_v33 = vpop.permute.xlu1 %674 }
  0xc8   : > { %v483_v29 = vpop.permute.xlu0 %482 }
  0xcc   : > { %v488_v56 = vpop.permute.xlu0 %487 }
 0x18a   : > { %v581_v3 = vpop.f32.mrb[0].mxu0  ;;  %v605_v4 = vpop.f32.mrb[0].mxu1 }
 0x18b   : > { %v582_v5 = vadd.f32 %v581_v3, %v453_v61  ;;  %v583_v6 = vpop.f32.mrb[1].mxu0  ;;  %v607_v7 = vpop.f32.mrb[1].mxu1  ;;  %v606_v36 = vadd.f32 %v605_v4, %v473_v23 }
 0x18c   : > { %v584_v8 = vadd.f32 %v583_v6, %v453_v61  ;;  %v608_v41 = vadd.f32 %v607_v7, %v473_v23 }
 0x18d   : > { %v628_v13 = vmax.f32 %v582_v5, 0.0  ;;  %v636_v39 = vmax.f32 %v606_v36, 0.0  ;;  %v986_v36 = vmov 1966171168  }
 0x18e   : > { %v587_v11 = vpop.f32.mrb[2].mxu0  ;;  %v611_v12 = vpop.f32.mrb[2].mxu1  ;;  %v629_v17 = vmax.f32 %v584_v8, 0.0  ;;  %v637_v57 = vmax.f32 %v608_v41, 0.0 }
 0x18f   : > { %v588_v14 = vadd.f32 %v587_v11, %v458_v60  ;;  %v589_v15 = vpop.f32.mrb[3].mxu0  ;;  %v613_v16 = vpop.f32.mrb[3].mxu1  ;;  %v692_v24 = vmul.f32 %v655_v1, %v628_v13  ;;  %v612_v46 = vadd.f32 %v611_v12, %v478_v10  ;;  %v700_v5 = vmul.f32 %v675_v33, %v636_v39 }
 0x190   : > { %v590_v18 = vadd.f32 %v589_v15, %v458_v60  ;;  %v693_v30 = vmul.f32 %v655_v1, %v629_v17  ;;  %v614_v51 = vadd.f32 %v613_v16, %v478_v10  ;;  %v680_v1 = vpop.permute.xlu1 %679  ;;  %v685_v13 = vpop.permute.xlu0 %684 }
 0x191   : > { %v630_v19 = vmax.f32 %v588_v14, 0.0  ;;  %v638_v61 = vmax.f32 %v612_v46, 0.0 }
 0x192   : > { %v631_v20 = vmax.f32 %v590_v18, 0.0  ;;  %v593_v21 = vpop.f32.mrb[4].mxu0  ;;  %v617_v22 = vpop.f32.mrb[4].mxu1  ;;  %v639_v23 = vmax.f32 %v614_v51, 0.0 }
 0x193   : > { %v694_v25 = vmul.f32 %v660_v0, %v630_v19  ;;  %v594_v26 = vadd.f32 %v593_v21, %v463_v63  ;;  %v595_v27 = vpop.f32.mrb[5].mxu0  ;;  %v619_v28 = vpop.f32.mrb[5].mxu1  ;;  %v618_v54 = vadd.f32 %v617_v22, %v483_v29  ;;  %v702_v10 = vmul.f32 %v680_v1, %v638_v61 }
 0x194   : > { %v695_v31 = vmul.f32 %v660_v0, %v631_v20  ;;  %v596_v32 = vadd.f32 %v595_v27, %v463_v63  ;;  %v620_v59 = vadd.f32 %v619_v28, %v483_v29  ;;  %v703_v14 = vmul.f32 %v680_v1, %v639_v23  ;;  %v690_v19 = vpop.permute.xlu1 %689 }
 0x195   : > { %v708_v37 = vadd.f32 %v694_v25, %v692_v24  ;;  %v632_v38 = vmax.f32 %v594_v26, 0.0  ;;  %v640_v6 = vmax.f32 %v618_v54, 0.0 }
 0x196   : > { %v721_v42 = vadd.f32 %v695_v31, %v693_v30  ;;  %v633_v43 = vmax.f32 %v596_v32, 0.0  ;;  %v599_v44 = vpop.f32.mrb[6].mxu0  ;;  %v623_v45 = vpop.f32.mrb[6].mxu1  ;;  %v641_v7 = vmax.f32 %v620_v59, 0.0 }
 0x197   : > { %v696_v47 = vmul.f32 %v665_v2, %v632_v38  ;;  %v600_v48 = vadd.f32 %v599_v44, %v468_v62  ;;  %v601_v49 = vpop.f32.mrb[7].mxu0  ;;  %v625_v50 = vpop.f32.mrb[7].mxu1  ;;  %v624_v0 = vadd.f32 %v623_v45, %v488_v56  ;;  %v704_v17 = vmul.f32 %v685_v13, %v640_v6 }
 0x198   : > { %v697_v52 = vmul.f32 %v665_v2, %v633_v43  ;;  %v602_v53 = vadd.f32 %v601_v49, %v468_v62  ;;  %v626_v4 = vadd.f32 %v625_v50, %v488_v56  ;;  %v701_v62 = vmul.f32 %v675_v33, %v637_v57 }
 0x199   : > { %v709_v40 = vadd.f32 %v708_v37, %v696_v47  ;;  %v634_v55 = vmax.f32 %v600_v48, 0.0  ;;  %v642_v12 = vmax.f32 %v624_v0, 0.0  ;;  %v705_v20 = vmul.f32 %v685_v13, %v641_v7 }
 0x19a   : > { %v722_v58 = vadd.f32 %v721_v42, %v697_v52  ;;  %v635_v60 = vmax.f32 %v602_v53, 0.0  ;;  %v643_v16 = vmax.f32 %v626_v4, 0.0  ;;  %v742_v37 = vunpack.c.l.s4 %v986_v36 }
 0x19b   : > { %v698_v63 = vmul.f32 %v670_v9, %v634_v55  ;;  %v735_v43 = vstv %s734_s23 }
 0x19c   : > { %v699_v3 = vmul.f32 %v670_v9, %v635_v60  ;;  %v706_v9 = vmul.f32 %v690_v19, %v642_v12  ;;  %v707_v24 = vmul.f32 %v690_v19, %v643_v16  ;;  %v743_v45 = vunpack.c.0.s8 %v742_v37 }
 0x19d   : > { %v710_v2 = vadd.f32 %v709_v40, %v698_v63 }
 0x19e   : > { %v723_v8 = vadd.f32 %v722_v58, %v699_v3  ;;  %v746_v50 = vsub.s32 %v743_v45, %v1179_v35 }
 0x19f   : > { %v711_v11 = vadd.f32 %v710_v2, %v700_v5 }
 0x1a0   : > { %v724_v15 = vadd.f32 %v723_v8, %v701_v62 }
 0x1a1   : > { %v712_v18 = vadd.f32 %v711_v11, %v702_v10 }
 0x1a2   : > { %v725_v21 = vadd.f32 %v724_v15, %v703_v14 }
 0x1a3   : > { %v713_v22 = vadd.f32 %v712_v18, %v704_v17 }
 0x1a4   : > { %v726_v25 = vadd.f32 %v725_v21, %v705_v20 }
 0x1a5   : > { %v714_v26 = vadd.f32 %v713_v22, %v706_v9 }
 0x1a6   : > { %v727_v27 = vadd.f32 %v726_v25, %v707_v24 }
 0x1a7   : > { %v715_v28 = vrot.slane %v714_v26, 4 }
 0x1a8   : > { %v728_v29 = vrot.slane %v727_v27, 4 }
 0x1a9   : > { %v716_v30 = vadd.f32 %v715_v28, %v714_v26 }
 0x1aa   : > { %v729_v31 = vadd.f32 %v728_v29, %v727_v27 }
 0x1ab   : > { %v717_v32 = vrot.slane %v716_v30, 2 }
 0x1ac   : > { %v730_v33 = vrot.slane %v729_v31, 2 }
 0x1ad   : > { %v718_v38 = vadd.f32 %v717_v32, %v716_v30 }
 0x1ae   : > { %v731_v41 = vadd.f32 %v730_v33, %v729_v31 }
 0x1af   : > { %v719_v42 = vrot.slane %v718_v38, 1 }
 0x1b0   : > { %v732_v44 = vrot.slane %v731_v41, 1 }
 0x1b1   : > { %v720_v46 = vadd.f32 %v719_v42, %v718_v38 }
 0x1b2   : > { %v733_v47 = vadd.f32 %v732_v44, %v731_v41 }
 0x1b3   : > { %v736_v48 = vadd.f32 %v735_v43, %v720_v46 }
 0x1b4   : > { %v737_v49 = vadd.f32 %v735_v43, %v733_v47 }
 0x1b6   : > { %v740_v51 = vcombine.low %v736_v48, %v737_v49 }
 0x1b8   : > { %v747_v52 = vrot.slane %v740_v51, %v746_v50 }
 0x1ba   : > { %v754_v53 = vrot.slane %v747_v52, %v746_v50 }
 0x1bc   : > { %760 = vst.msk [vmem:[%s271_s9] sm:$0x3] %vm758_vm1, %v754_v53 }
 0x1bd   : > { %933 = shalt.err (!%p930_p3)
}
 0x1be   : > { %s934_s21 = scalar_lea.hbm %s1251_s16, 32  ;;  %s938_s24 = scalar_lea.hbm %s1300_s7, 64 }
 0x1bf   : > { %p935_p4 = scmp.ne.s32.totalorder %s1251_s16, %s934_s21  ;;  %p939_p9 = scmp.lt.u32.totalorder %s1251_s16, %s1300_s7 }
 0x1c0   : > { %p940_p10 = scmp.lt.u32.totalorder %s938_s24, %s934_s21  ;;  %p942_p12 = scmp.lt.u32.totalorder %s934_s21, %s1251_s16 }
 0x1c1   : > { %p936_p7 = pnand %p935_p4, %p1069_p5 }
 0x1c2   : > { %p941_p11 = por %p940_p10, %p939_p9 }
 0x1c3   : > { %p937_p8 = pneg %p936_p7 }
 0x1c4   : > { %p943_p13 = por %p942_p12, %p941_p11 }
 0x1c6   : > { %p944_p0 = pnand %p943_p13, %p937_p8 }
 0x1c8   : > { %947 = shalt.err (!%p944_p0)
}
 0x1c9   : > { %876 = dma.vmem_to_hbm [thread:$0]  (%p1069_p5), %s1253_s10, 32, %s1251_s16, %s762_s17  }
 0x1ca PF: > { %p882_p1 = scmp.ge.s32.totalorder %s982_s29, 2  ;;  %s788_s9 = sand.u32 1, %s970_s26  }
 0x1cb   : > { %s789_s14 = scalar_lea.sflag [#allocation4], %s788_s9 }
 0x1cc   : > { %p879_p2 = pnand %p882_p1, %p1073_p6 }
 0x1ce   : > { %965 = dma.done.wait (!%p879_p2), %s789_s14, 32  }
 0x1cf   : > { %967 = vsyncadd (!%p879_p2), %s789_s14, 4294967264  ;;  %p18_p3 = scmp.ge.s32.totalorder %s1056_s8, 4   ;;  %s1303_s26 = smov %s974_s27 }
 0x1d0   : > { %s1304_s27 = smov %s978_s28  ;;  %s1305_s28 = smov %s1067_s11 }
 0x1d1   : > { %s1306_s29 = smov %s1056_s8  ;;  %20 = sbr.rel (!%p18_p3) target bundleno = 5 (0x5), region = 83 }
 0x1d8   :  { %794 = vsyncpa [#allocation4], 1 }
 0x1d9   :  { %796 = vsyncpa [#allocation4 + $0x1], 1 }

</bundles_post_ra>
